<compile_context>
chip_gen: v6e
topology: v6e:2x2x1
jax: 0.10.0
libtpu: 0.0.40
codegen_flags: <defaults>
</compile_context>

<pallas_src>
import functools

import jax
import jax.numpy as jnp
from jax import lax
from jax.experimental import pallas as pl
from jax.experimental.pallas import tpu as pltpu


# ---------------- Fused Pallas kernel (the hot path) ----------------

def _make_fused_mlp_kernel(n_hidden, compute_dtype, epilogue_dtype):
    """Kernel refs: (x, w0, b0, ..., w_{n-1}, b_{n-1}, w_last, out)."""

    def kernel(*refs):
        x_ref = refs[0]
        o_ref = refs[-1]
        wb = refs[1:-1]

        # x tile: (tb, Din). Cast in VMEM -> no extra HBM round trip.
        x = x_ref[...].astype(compute_dtype)

        # Layer 0: contract the feature axis of x directly on the MXU.
        # w0: (D1, Din), x: (tb, Din)  ->  y: (D1, tb)   (batch on lanes)
        w0 = wb[0][...]
        b0 = wb[1][...]                              # (D1, 1), epilogue dtype
        y = lax.dot_general(w0, x, (((1,), (1,)), ((), ())),
                            preferred_element_type=jnp.float32)
        h = jnp.tanh(y.astype(epilogue_dtype) + b0).astype(compute_dtype)

        # Remaining hidden layers: W @ h, bias-add + tanh epilogue.
        for li in range(1, n_hidden):
            w = wb[2 * li][...]                      # (Dout, Din), compute dtype
            b = wb[2 * li + 1][...]                  # (Dout, 1),  epilogue dtype
            y = jnp.dot(w, h, preferred_element_type=jnp.float32)
            h = jnp.tanh(y.astype(epilogue_dtype) + b).astype(compute_dtype)

        # Final layer: no bias, no activation, f32 accumulate + f32 output.
        w_last = wb[-1][...]
        out = jnp.dot(w_last, h, preferred_element_type=jnp.float32)
        o_ref[...] = out.astype(o_ref.dtype)

    return kernel


# ---------------- One-time parameter packing (outside the hot path) ----------------

def pack_params(params, compute_dtype=jnp.bfloat16, epilogue_dtype=jnp.bfloat16):
    """Cast / reshape weights & biases once; returns a flat tuple:
    (w0, b0, w1, b1, ..., w_last). PyTorch layout W:(out, in); last bias is None.
    For v5e use epilogue_dtype=jnp.float32 (no bf16 VPU/EUP)."""
    assert len(params) >= 2 and params[-1][1] is None
    packed = []
    for w, b in params[:-1]:
        packed.append(jnp.asarray(w, compute_dtype))
        packed.append(jnp.asarray(b, epilogue_dtype).reshape(-1, 1))
    packed.append(jnp.asarray(params[-1][0], compute_dtype))
    return tuple(packed)


# ---------------- Wrapper around pallas_call ----------------

def _round_up(n, m):
    return ((n + m - 1) // m) * m


@functools.partial(jax.jit,
                   static_argnames=("tb", "compute_dtype", "epilogue_dtype"))
def mlp_forward(x, packed_params, tb=512,
                compute_dtype=jnp.bfloat16, epilogue_dtype=jnp.bfloat16):
    """Forward pass. x: (B, Din); packed_params from pack_params()."""
    B, Din = x.shape
    n_hidden = (len(packed_params) - 1) // 2
    assert n_hidden >= 1
    dout_last = packed_params[-1].shape[0]

    # Batch tiling: lane minimum is 128 (don't over-pad tiny batches); split
    # large batches into >= 2 tiles so megacore / the pipeline have work.
    b128 = _round_up(B, 128)
    tb_eff = min(tb, b128)
    if (b128 // tb_eff) < 2 and b128 >= 256:
        tb_eff = max(128, _round_up(b128 // 2, 128))
    b_pad = _round_up(B, tb_eff)

    # Zero-pad the batch only when needed (static shapes -> Python branch).
    if b_pad != B:
        x_in = jnp.zeros((b_pad, Din), x.dtype).at[:B, :].set(x)
    else:
        x_in = x

    grid = (b_pad // tb_eff,)

    # Input specs: per-tile activation block, then grid-constant weights/biases
    # (full-array blocks -> resident in VMEM across the whole grid).
    in_specs = [pl.BlockSpec((tb_eff, Din), lambda i: (i, 0))]
    for p in packed_params:
        in_specs.append(pl.BlockSpec(p.shape, lambda i: (0, 0)))
    out_spec = pl.BlockSpec((dout_last, tb_eff), lambda i: (0, i))

    outT = pl.pallas_call(
        _make_fused_mlp_kernel(n_hidden, compute_dtype, epilogue_dtype),
        out_shape=jax.ShapeDtypeStruct((dout_last, b_pad), jnp.float32),
        grid_spec=pl.GridSpec(grid=grid, in_specs=in_specs, out_specs=out_spec),
        compiler_params=pltpu.CompilerParams(
            dimension_semantics=("parallel",)),
    )(x_in, *packed_params)

    # Back to (B, Dout_last), dropping batch padding (tiny copy).
    return outT[:, :B].T


# ---------------- Deterministic parameter init (PyTorch-like) ----------------

def init_mlp_params(key, mlp_layers):
    """Weights in PyTorch layout (out, in); last layer bias=False."""
    params = []
    n_layers = len(mlp_layers) - 1
    for i in range(n_layers):
        fan_in, fan_out = mlp_layers[i], mlp_layers[i + 1]
        key, kw, kb = jax.random.split(key, 3)
        bound = 1.0 / float(fan_in) ** 0.5
        w = jax.random.uniform(kw, (fan_out, fan_in), jnp.float32,
                               minval=-bound, maxval=bound)
        if i < n_layers - 1:
            b = jax.random.uniform(kb, (fan_out,), jnp.float32,
                                   minval=-bound, maxval=bound)
        else:
            b = None  # last layer: bias=False
        params.append((w, b))
    return params


# ---------------- Pure-JAX reference for sanity checks ----------------

def mlp_reference(x, params):
    h = x
    n = len(params)
    for li, (w, b) in enumerate(params):
        h = h @ w.T
        if li < n - 1:
            h = jnp.tanh(h + b)
    return h


if __name__ == "__main__":
    # Shapes consistent with the module: 20-d input, 3 hidden layers, 1-d output.
    mlp_layers = [20, 32, 32, 32, 1]
    batch = 16

    key = jax.random.PRNGKey(0)
    key, kx = jax.random.split(key)
    x = jax.random.normal(kx, (batch, mlp_layers[0]), jnp.float32)
    params = init_mlp_params(key, mlp_layers)
    ref = mlp_reference(x, params)

    # Exact f32 path (tight check against the pure-JAX reference).
    packed_f32 = pack_params(params, jnp.float32, jnp.float32)
    out = mlp_forward(x, packed_f32,
                      compute_dtype=jnp.float32, epilogue_dtype=jnp.float32)
    out = jax.block_until_ready(out)
    assert out.shape == (batch, mlp_layers[-1])
    assert jnp.allclose(out, ref, atol=1e-5, rtol=1e-5)

    # Default bf16 path (v6e/v7x). For v5e pass epilogue_dtype=jnp.float32.
    packed_bf16 = pack_params(params)
    out_bf16 = jax.block_until_ready(mlp_forward(x, packed_bf16))
    assert out_bf16.shape == (batch, mlp_layers[-1])
    assert float(jnp.max(jnp.abs(out_bf16 - ref))) < 1e-1

    # Larger batch: exercises the multi-tile grid (megacore / pipeline path).
    big_B = 1000
    key, kb = jax.random.split(key)
    xb = jax.random.normal(kb, (big_B, mlp_layers[0]), jnp.float32)
    out_big = jax.block_until_ready(mlp_forward(xb, packed_bf16))
    ref_big = mlp_reference(xb, params)
    assert out_big.shape == (big_B, mlp_layers[-1])
    assert float(jnp.max(jnp.abs(out_big - ref_big))) < 1e-1

    print("KERNEL_OK")
</pallas_src>

<mosaic_0001>
module attributes {stable_mosaic.version = 11 : i64} {
  func.func @kernel(%arg0: i32, %arg1: memref<128x20xf32, #tpu.memory_space<vmem>>, %arg2: memref<32x20xf32, #tpu.memory_space<vmem>>, %arg3: memref<32x1xf32, #tpu.memory_space<vmem>>, %arg4: memref<32x32xf32, #tpu.memory_space<vmem>>, %arg5: memref<32x1xf32, #tpu.memory_space<vmem>>, %arg6: memref<32x32xf32, #tpu.memory_space<vmem>>, %arg7: memref<32x1xf32, #tpu.memory_space<vmem>>, %arg8: memref<1x32xf32, #tpu.memory_space<vmem>>, %arg9: memref<1x128xf32, #tpu.memory_space<vmem>>) attributes {dimension_semantics = [#tpu.dimension_semantics<parallel>], iteration_bounds = array<i64: 1>, scalar_prefetch = 0 : i64, scratch_operands = 0 : i64, tpu.core_type = #tpu.core_type<tc>, window_params = [{transform_indices = @transform_0, window_bounds = array<i64: 128, 20>}, {pipeline_mode = #tpu.pipeline_mode<synchronous>, transform_indices = @transform_1, window_bounds = array<i64: 32, 20>}, {pipeline_mode = #tpu.pipeline_mode<synchronous>, transform_indices = @transform_2, window_bounds = array<i64: 32, 1>}, {pipeline_mode = #tpu.pipeline_mode<synchronous>, transform_indices = @transform_3, window_bounds = array<i64: 32, 32>}, {pipeline_mode = #tpu.pipeline_mode<synchronous>, transform_indices = @transform_4, window_bounds = array<i64: 32, 1>}, {pipeline_mode = #tpu.pipeline_mode<synchronous>, transform_indices = @transform_5, window_bounds = array<i64: 32, 32>}, {pipeline_mode = #tpu.pipeline_mode<synchronous>, transform_indices = @transform_6, window_bounds = array<i64: 32, 1>}, {pipeline_mode = #tpu.pipeline_mode<synchronous>, transform_indices = @transform_7, window_bounds = array<i64: 1, 32>}, {transform_indices = @transform_8, window_bounds = array<i64: 1, 128>}]} {
    %c0 = arith.constant 0 : index
    %c0_0 = arith.constant 0 : index
    %0 = vector.load %arg1[%c0, %c0_0] : memref<128x20xf32, #tpu.memory_space<vmem>>, vector<128x20xf32>
    %c0_1 = arith.constant 0 : index
    %c0_2 = arith.constant 0 : index
    %1 = vector.load %arg2[%c0_1, %c0_2] : memref<32x20xf32, #tpu.memory_space<vmem>>, vector<32x20xf32>
    %c0_3 = arith.constant 0 : index
    %c0_4 = arith.constant 0 : index
    %2 = vector.load %arg3[%c0_3, %c0_4] : memref<32x1xf32, #tpu.memory_space<vmem>>, vector<32x1xf32>
    %cst = arith.constant dense<0.000000e+00> : vector<32x128xf32>
    %3 = tpu.matmul %1, %0, %cst {dimension_numbers = #tpu.dot_dimension_numbers<[1], [1], [0], [0], [0, 0, 1, 0], [], []>} : vector<32x20xf32>, vector<128x20xf32>, vector<32x128xf32> -> vector<32x128xf32>
    %4 = vector.broadcast %2 : vector<32x1xf32> to vector<32x128xf32>
    %5 = arith.addf %3, %4 : vector<32x128xf32>
    %6 = math.tanh %5 : vector<32x128xf32>
    %c0_5 = arith.constant 0 : index
    %c0_6 = arith.constant 0 : index
    %7 = vector.load %arg4[%c0_5, %c0_6] : memref<32x32xf32, #tpu.memory_space<vmem>>, vector<32x32xf32>
    %c0_7 = arith.constant 0 : index
    %c0_8 = arith.constant 0 : index
    %8 = vector.load %arg5[%c0_7, %c0_8] : memref<32x1xf32, #tpu.memory_space<vmem>>, vector<32x1xf32>
    %cst_9 = arith.constant dense<0.000000e+00> : vector<32x128xf32>
    %9 = tpu.matmul %7, %6, %cst_9 {dimension_numbers = #tpu.dot_dimension_numbers<[1], [0], [0], [1], [0, 0, 1, 1], [], []>} : vector<32x32xf32>, vector<32x128xf32>, vector<32x128xf32> -> vector<32x128xf32>
    %10 = vector.broadcast %8 : vector<32x1xf32> to vector<32x128xf32>
    %11 = arith.addf %9, %10 : vector<32x128xf32>
    %12 = math.tanh %11 : vector<32x128xf32>
    %c0_10 = arith.constant 0 : index
    %c0_11 = arith.constant 0 : index
    %13 = vector.load %arg6[%c0_10, %c0_11] : memref<32x32xf32, #tpu.memory_space<vmem>>, vector<32x32xf32>
    %c0_12 = arith.constant 0 : index
    %c0_13 = arith.constant 0 : index
    %14 = vector.load %arg7[%c0_12, %c0_13] : memref<32x1xf32, #tpu.memory_space<vmem>>, vector<32x1xf32>
    %cst_14 = arith.constant dense<0.000000e+00> : vector<32x128xf32>
    %15 = tpu.matmul %13, %12, %cst_14 {dimension_numbers = #tpu.dot_dimension_numbers<[1], [0], [0], [1], [0, 0, 1, 1], [], []>} : vector<32x32xf32>, vector<32x128xf32>, vector<32x128xf32> -> vector<32x128xf32>
    %16 = vector.broadcast %14 : vector<32x1xf32> to vector<32x128xf32>
    %17 = arith.addf %15, %16 : vector<32x128xf32>
    %18 = math.tanh %17 : vector<32x128xf32>
    %c0_15 = arith.constant 0 : index
    %c0_16 = arith.constant 0 : index
    %19 = vector.load %arg8[%c0_15, %c0_16] : memref<1x32xf32, #tpu.memory_space<vmem>>, vector<1x32xf32>
    %cst_17 = arith.constant dense<0.000000e+00> : vector<1x128xf32>
    %20 = tpu.matmul %19, %18, %cst_17 {dimension_numbers = #tpu.dot_dimension_numbers<[1], [0], [0], [1], [0, 0, 1, 1], [], []>} : vector<1x32xf32>, vector<32x128xf32>, vector<1x128xf32> -> vector<1x128xf32>
    %c0_18 = arith.constant 0 : index
    %c0_19 = arith.constant 0 : index
    %21 = vector.load %arg9[%c0_18, %c0_19] : memref<1x128xf32, #tpu.memory_space<vmem>>, vector<1x128xf32>
    tpu.vector_store %arg9[%c0_18, %c0_19], %20 {strides = array<i32>} : memref<1x128xf32, #tpu.memory_space<vmem>>, vector<1x128xf32>,
    return
  }
  func.func @transform_0(%arg0: i32) -> (i32, i32) {
    %c0_i32 = arith.constant 0 : i32
    %c0_i32_0 = arith.constant 0 : i32
    return %arg0, %c0_i32 : i32, i32
  }
  func.func @transform_1(%arg0: i32) -> (i32, i32) {
    %c0_i32 = arith.constant 0 : i32
    %c0_i32_0 = arith.constant 0 : i32
    %c0_i32_1 = arith.constant 0 : i32
    return %c0_i32, %c0_i32_0 : i32, i32
  }
  func.func @transform_2(%arg0: i32) -> (i32, i32) {
    %c0_i32 = arith.constant 0 : i32
    %c0_i32_0 = arith.constant 0 : i32
    %c0_i32_1 = arith.constant 0 : i32
    return %c0_i32, %c0_i32_0 : i32, i32
  }
  func.func @transform_3(%arg0: i32) -> (i32, i32) {
    %c0_i32 = arith.constant 0 : i32
    %c0_i32_0 = arith.constant 0 : i32
    %c0_i32_1 = arith.constant 0 : i32
    return %c0_i32, %c0_i32_0 : i32, i32
  }
  func.func @transform_4(%arg0: i32) -> (i32, i32) {
    %c0_i32 = arith.constant 0 : i32
    %c0_i32_0 = arith.constant 0 : i32
    %c0_i32_1 = arith.constant 0 : i32
    return %c0_i32, %c0_i32_0 : i32, i32
  }
  func.func @transform_5(%arg0: i32) -> (i32, i32) {
    %c0_i32 = arith.constant 0 : i32
    %c0_i32_0 = arith.constant 0 : i32
    %c0_i32_1 = arith.constant 0 : i32
    return %c0_i32, %c0_i32_0 : i32, i32
  }
  func.func @transform_6(%arg0: i32) -> (i32, i32) {
    %c0_i32 = arith.constant 0 : i32
    %c0_i32_0 = arith.constant 0 : i32
    %c0_i32_1 = arith.constant 0 : i32
    return %c0_i32, %c0_i32_0 : i32, i32
  }
  func.func @transform_7(%arg0: i32) -> (i32, i32) {
    %c0_i32 = arith.constant 0 : i32
    %c0_i32_0 = arith.constant 0 : i32
    %c0_i32_1 = arith.constant 0 : i32
    return %c0_i32, %c0_i32_0 : i32, i32
  }
  func.func @transform_8(%arg0: i32) -> (i32, i32) {
    %c0_i32 = arith.constant 0 : i32
    %c0_i32_0 = arith.constant 0 : i32
    return %c0_i32, %arg0 : i32, i32
  }
}

</mosaic_0001>

<bundles_post_ra>
// kernel: mlp_forward.1
= control target key start
LH: loop header
LB: loop body
LE: loop exit
PB: predicated region body
PF: predicated region fallthrough
CT: control target
= control target key end

     0   :  { %vm73_vm0 = vcmask 162816   ;;  %v737_v2 = vmov 0   ;;  %vm251_vm1 = vcmask 261120   ;;  %vm739_vm2 = vmmov 0   ;;  %s956_s0 = inlined_call_operand.vmem [shape: f32[128,20], index: 0, kind: input, shape index: {}]   ;;  %s957_s1 = inlined_call_operand.vmem [shape: f32[32,20], index: 1, kind: input, shape index: {}]   ;;  %s958_s2 = inlined_call_operand.vmem [shape: f32[32,1], index: 2, kind: input, shape index: {}]   ;;  %s959_s4 = inlined_call_operand.vmem [shape: f32[32,1], index: 4, kind: input, shape index: {}]   ;;  %s960_s6 = inlined_call_operand.vmem [shape: f32[32,1], index: 6, kind: input, shape index: {}]   ;;  %s961_s3 = inlined_call_operand.vmem [shape: f32[32,32], index: 3, kind: input, shape index: {}]   ;;  %s962_s5 = inlined_call_operand.vmem [shape: f32[32,32], index: 5, kind: input, shape index: {}]   ;;  %s963_s7 = inlined_call_operand.vmem [shape: f32[1,32], index: 7, kind: input, shape index: {}]   ;;  %s964_s8 = inlined_call_operand.vmem [shape: f32[1,128], index: 8, kind: output, shape index: {}]  }
   0x1   :  { %v44_v0 = vld [vmem:[%s956_s0 + $0x78] sm:$0xff]  ;;  %v43_v1 = vld [vmem:[%s956_s0 + $0x70] sm:$0xff]  ;;  %711 = vset.pattern.permute.xlu0 %v737_v2  ;;  %712 = vset.pattern.permute.xlu1 %v737_v2  ;;  %v42_v3 = vld [vmem:[%s956_s0 + $0x68] sm:$0xff] }
   0x2   :  { %631 = vmatprep.subr.msk.mxu0 %vm73_vm0, %v44_v0  ;;  %v45_v4 = vld [vmem:[%s957_s1] sm:$0xff]  ;;  %v52_v5 = vld [vmem:[%s958_s2 + $0x18] sm:$0xff]  ;;  %v50_v6 = vld [vmem:[%s958_s2 + $0x8] sm:$0xff] }
   0x3   :  { %632 = vmatpush3.xpose.msk.msra.mxu0 %vm73_vm0, %v44_v0  ;;  %663 = vmatprep.mubr.msk.f32.mxu0 %vm73_vm0, %v45_v4  ;;  %v41_v7 = vld [vmem:[%s956_s0 + $0x60] sm:$0xff]  ;;  %v51_v8 = vld [vmem:[%s958_s2 + $0x10] sm:$0xff]  ;;  %v40_v10 = vld [vmem:[%s956_s0 + $0x58] sm:$0xff] }
   0x4   :  { %633 = vmatprep.subr.msk.mxu0 %vm73_vm0, %v43_v1  ;;  %70 = vperm.xlu0 %711, %v52_v5   ;;  %v49_v9 = vld [vmem:[%s958_s2] sm:$0xff]  ;;  %v230_v11 = vld [vmem:[%s959_s4 + $0x18] sm:$0xff]  ;;  %v229_v12 = vld [vmem:[%s959_s4 + $0x10] sm:$0xff] }
   0x5   :  { %60 = vperm.xlu1 %712, %v50_v6   ;;  %v39_v13 = vld [vmem:[%s956_s0 + $0x50] sm:$0xff]  ;;  %v228_v14 = vld [vmem:[%s959_s4 + $0x8] sm:$0xff]  ;;  %v227_v15 = vld [vmem:[%s959_s4] sm:$0xff] }
   0x6   :  { %v38_v16 = vld [vmem:[%s956_s0 + $0x48] sm:$0xff]  ;;  %v360_v17 = vld [vmem:[%s960_s6 + $0x18] sm:$0xff]  ;;  %v359_v18 = vld [vmem:[%s960_s6 + $0x10] sm:$0xff] }
   0x7   :  { %634 = vmatpush3.xpose.msk.msra.mxu0 %vm73_vm0, %v43_v1  ;;  %v37_v19 = vld [vmem:[%s956_s0 + $0x40] sm:$0xff]  ;;  %v358_v20 = vld [vmem:[%s960_s6 + $0x8] sm:$0xff]  ;;  %v36_v22 = vld [vmem:[%s956_s0 + $0x38] sm:$0xff] }
   0x8   :  { %635 = vmatprep.subr.msk.mxu0 %vm73_vm0, %v42_v3  ;;  %65 = vperm.xlu0 %711, %v51_v8   ;;  %v357_v21 = vld [vmem:[%s960_s6] sm:$0xff]  ;;  %v35_v23 = vld [vmem:[%s956_s0 + $0x30] sm:$0xff]  ;;  %v34_v24 = vld [vmem:[%s956_s0 + $0x28] sm:$0xff] }
   0x9   :  { %55 = vperm.xlu1 %712, %v49_v9   ;;  %v33_v25 = vld [vmem:[%s956_s0 + $0x20] sm:$0xff]  ;;  %v32_v26 = vld [vmem:[%s956_s0 + $0x18] sm:$0xff]  ;;  %v31_v27 = vld [vmem:[%s956_s0 + $0x10] sm:$0xff]  ;;  %v738_v9 = vmov 0.0  }
   0xa   :  { %v30_v28 = vld [vmem:[%s956_s0 + $0x8] sm:$0xff]  ;;  %v29_v29 = vld [vmem:[%s956_s0] sm:$0xff]  ;;  %v47_v31 = vld [vmem:[%s957_s1 + $0x10] sm:$0xff] }
   0xb   :  { %636 = vmatpush3.xpose.msk.msra.mxu0 %vm73_vm0, %v42_v3  ;;  %v46_v30 = vld [vmem:[%s957_s1 + $0x8] sm:$0xff]  ;;  %v48_v32 = vld [vmem:[%s957_s1 + $0x18] sm:$0xff]  ;;  %v223_v33 = vld [vmem:[%s961_s3] sm:$0xff] }
   0xc   :  { %637 = vmatprep.subr.msk.mxu0 %vm73_vm0, %v41_v7  ;;  %248 = vperm.xlu0 %711, %v230_v11   ;;  %v224_v50 = vld [vmem:[%s961_s3 + $0x8] sm:$0xff]  ;;  %v225_v51 = vld [vmem:[%s961_s3 + $0x10] sm:$0xff]  ;;  %v226_v52 = vld [vmem:[%s961_s3 + $0x18] sm:$0xff] }
   0xd   :  { %243 = vperm.xlu1 %712, %v229_v12   ;;  %677 = vmatprep.mubr.msk.f32.mxu1 %vm251_vm1, %v223_v33  ;;  %v353_v53 = vld [vmem:[%s962_s5] sm:$0xff]  ;;  %v354_v6 = vld [vmem:[%s962_s5 + $0x8] sm:$0xff]  ;;  %v356_v8 = vld [vmem:[%s962_s5 + $0x18] sm:$0xff] }
   0xf   :  { %638 = vmatpush3.xpose.msk.msra.mxu0 %vm73_vm0, %v41_v7  ;;  %v355_v7 = vld [vmem:[%s962_s5 + $0x10] sm:$0xff] }
  0x10   :  { %639 = vmatprep.subr.msk.mxu0 %vm73_vm0, %v40_v10  ;;  %238 = vperm.xlu0 %711, %v228_v14  }
  0x11   :  { %233 = vperm.xlu1 %712, %v227_v15  }
  0x13   :  { %640 = vmatpush3.xpose.msk.msra.mxu0 %vm73_vm0, %v40_v10 }
  0x14   :  { %641 = vmatprep.subr.msk.mxu0 %vm73_vm0, %v39_v13  ;;  %378 = vperm.xlu0 %711, %v360_v17  }
  0x15   :  { %373 = vperm.xlu1 %712, %v359_v18  }
  0x17   :  { %642 = vmatpush3.xpose.msk.msra.mxu0 %vm73_vm0, %v39_v13 }
  0x18   :  { %643 = vmatprep.subr.msk.mxu0 %vm73_vm0, %v38_v16  ;;  %368 = vperm.xlu0 %711, %v358_v20  }
  0x19   :  { %363 = vperm.xlu1 %712, %v357_v21  }
  0x1b   :  { %644 = vmatpush3.xpose.msk.msra.mxu0 %vm73_vm0, %v38_v16 }
  0x1c   :  { %645 = vmatprep.subr.msk.mxu0 %vm73_vm0, %v37_v19 }
  0x1f   :  { %646 = vmatpush3.xpose.msk.msra.mxu0 %vm73_vm0, %v37_v19 }
  0x20   :  { %647 = vmatprep.subr.msk.mxu0 %vm73_vm0, %v36_v22 }
  0x23   :  { %648 = vmatpush3.xpose.msk.msra.mxu0 %vm73_vm0, %v36_v22 }
  0x24   :  { %649 = vmatprep.subr.msk.mxu0 %vm73_vm0, %v35_v23 }
  0x27   :  { %650 = vmatpush3.xpose.msk.msra.mxu0 %vm73_vm0, %v35_v23 }
  0x28   :  { %651 = vmatprep.subr.msk.mxu0 %vm73_vm0, %v34_v24 }
  0x2b   :  { %652 = vmatpush3.xpose.msk.msra.mxu0 %vm73_vm0, %v34_v24 }
  0x2c   :  { %653 = vmatprep.subr.msk.mxu0 %vm73_vm0, %v33_v25 }
  0x2f   :  { %654 = vmatpush3.xpose.msk.msra.mxu0 %vm73_vm0, %v33_v25  ;;  %v482_v25 = vld [vmem:[%s963_s7] sm:$0x1] }
  0x30   :  { %655 = vmatprep.subr.msk.mxu0 %vm73_vm0, %v32_v26 }
  0x33   :  { %656 = vmatpush3.xpose.msk.msra.mxu0 %vm73_vm0, %v32_v26 }
  0x34   :  { %657 = vmatprep.subr.msk.mxu0 %vm73_vm0, %v31_v27 }
  0x37   :  { %658 = vmatpush3.xpose.msk.msra.mxu0 %vm73_vm0, %v31_v27 }
  0x38   :  { %659 = vmatprep.subr.msk.mxu0 %vm73_vm0, %v30_v28 }
  0x3b   :  { %660 = vmatpush3.xpose.msk.msra.mxu0 %vm73_vm0, %v30_v28 }
  0x3c   :  { %661 = vmatprep.subr.msk.mxu0 %vm73_vm0, %v29_v29 }
  0x3f   :  { %662 = vmatpush3.xpose.msk.msra.mxu0 %vm73_vm0, %v29_v29 }
  0x42   :  { %664 = vmatmul.mubr.msk.f32.vlgmr.msra.gmra.mxu0 %vm73_vm0, %v46_v30 }
  0x43   :  { %666 = vmatprep.mubr.msk.f32.mxu0 %vm73_vm0, %v47_v31 }
  0x46   :  { %667 = vmatmul.mubr.msk.f32.gmra.mxu0 %vm73_vm0, %v48_v32 }
  0x7f   :  { %v71_v34 = vpop.permute.xlu0 %70 }
  0x80   :  { %v61_v36 = vpop.permute.xlu1 %60 }
  0x83   :  { %v66_v40 = vpop.permute.xlu0 %65 }
  0x84   :  { %v56_v44 = vpop.permute.xlu1 %55 }
  0x87   :  { %v249_v54 = vpop.permute.xlu0 %248 }
  0x88   :  { %v244_v56 = vpop.permute.xlu1 %243 }
  0x8b   :  { %v239_v60 = vpop.permute.xlu0 %238 }
  0x8c   :  { %v234_v0 = vpop.permute.xlu1 %233 }
  0x8f   :  { %v379_v10 = vpop.permute.xlu0 %378 }
  0x90   :  { %v374_v12 = vpop.permute.xlu1 %373 }
  0x93   :  { %v369_v16 = vpop.permute.xlu0 %368 }
  0x94   :  { %v364_v20 = vpop.permute.xlu1 %363 }
 0x102   :  { %v665_v35 = vpop.f32.mrf.mxu0 }
 0x103   :  { %v206_v42 = vadd.f32 %v665_v35, %v61_v36 }
 0x104   :  { %v200_v37 = vpop.f32.mrf.mxu0 }
 0x105   :  { %v201_v45 = vadd.f32 %v200_v37, %v56_v44 }
 0x106   :  { %v668_v38 = vpop.f32.mrf.mxu0 }
 0x107   :  { %v216_v39 = vadd.f32 %v668_v38, %v71_v34 }
 0x108   :  { %v210_v41 = vpop.f32.mrf.mxu0 }
 0x109   :  { %713 = vtanh.f32 %v216_v39  ;;  %v211_v43 = vadd.f32 %v210_v41, %v66_v40 }
 0x10b   :  { %715 = vtanh.f32 %v211_v43 }
 0x10c   :  { %717 = vtanh.f32 %v206_v42 }
 0x10d   :  { %719 = vtanh.f32 %v201_v45 }
 0x116   :  { %v714_v46 = vpop.eup %713 }
 0x117   :  { %669 = vmatprep.subr.mxu1 %v714_v46 }
 0x118   :  { %v716_v47 = vpop.eup %715  ;;  %670 = vmatpush3.msra.mxu1 %v714_v46 }
 0x119   :  { %671 = vmatprep.subr.mxu1 %v716_v47  ;;  %v718_v48 = vpop.eup %717 }
 0x11a   :  { %672 = vmatpush3.msra.mxu1 %v716_v47  ;;  %v720_v49 = vpop.eup %719 }
 0x11b   :  { %673 = vmatprep.subr.mxu1 %v718_v48 }
 0x11c   :  { %674 = vmatpush3.msra.mxu1 %v718_v48 }
 0x11d   :  { %675 = vmatprep.subr.mxu1 %v720_v49 }
 0x11e   :  { %676 = vmatpush3.msra.mxu1 %v720_v49 }
 0x11f   :  { %678 = vmatmul.mubr.msk.f32.vlgmr.msra.gmra.mxu1 %vm251_vm1, %v224_v50 }
 0x120   :  { %680 = vmatprep.mubr.msk.f32.mxu1 %vm251_vm1, %v225_v51 }
 0x123   :  { %681 = vmatmul.mubr.msk.f32.gmra.mxu1 %vm251_vm1, %v226_v52 }
 0x124   :  { %691 = vmatprep.mubr.msk.f32.mxu1 %vm251_vm1, %v353_v53 }
 0x1df   :  { %v679_v55 = vpop.f32.mrf.mxu1 }
 0x1e0   :  { %v336_v62 = vadd.f32 %v679_v55, %v239_v60 }
 0x1e1   :  { %v330_v57 = vpop.f32.mrf.mxu1 }
 0x1e2   :  { %v331_v1 = vadd.f32 %v330_v57, %v234_v0 }
 0x1e3   :  { %v682_v58 = vpop.f32.mrf.mxu1 }
 0x1e4   :  { %v346_v59 = vadd.f32 %v682_v58, %v249_v54 }
 0x1e5   :  { %v340_v61 = vpop.f32.mrf.mxu1 }
 0x1e6   :  { %721 = vtanh.f32 %v346_v59  ;;  %v341_v63 = vadd.f32 %v340_v61, %v244_v56 }
 0x1e8   :  { %723 = vtanh.f32 %v341_v63 }
 0x1e9   :  { %725 = vtanh.f32 %v336_v62 }
 0x1ea   :  { %727 = vtanh.f32 %v331_v1 }
 0x1f3   :  { %v722_v2 = vpop.eup %721 }
 0x1f4   :  { %683 = vmatprep.subr.mxu1 %v722_v2 }
 0x1f5   :  { %v724_v3 = vpop.eup %723  ;;  %684 = vmatpush3.msra.mxu1 %v722_v2 }
 0x1f6   :  { %685 = vmatprep.subr.mxu1 %v724_v3  ;;  %v726_v4 = vpop.eup %725 }
 0x1f7   :  { %686 = vmatpush3.msra.mxu1 %v724_v3  ;;  %v728_v5 = vpop.eup %727 }
 0x1f8   :  { %687 = vmatprep.subr.mxu1 %v726_v4 }
 0x1f9   :  { %688 = vmatpush3.msra.mxu1 %v726_v4 }
 0x1fa   :  { %689 = vmatprep.subr.mxu1 %v728_v5 }
 0x1fb   :  { %690 = vmatpush3.msra.mxu1 %v728_v5 }
 0x1fc   :  { %692 = vmatmul.mubr.msk.f32.vlgmr.msra.gmra.mxu1 %vm251_vm1, %v354_v6  ;;  %697 = vmatprep.subr.mxu1 %v738_v9 }
 0x1fd   :  { %694 = vmatprep.mubr.msk.f32.mxu1 %vm251_vm1, %v355_v7 }
 0x200   :  { %695 = vmatmul.mubr.msk.f32.gmra.mxu1 %vm251_vm1, %v356_v8 }
 0x201   :  { %705 = vmatprep.mubr.msk.f32.mxu1 %vm739_vm2, %v738_v9 }
 0x2bc   :  { %v693_v11 = vpop.f32.mrf.mxu1 }
 0x2bd   :  { %v465_v18 = vadd.f32 %v693_v11, %v369_v16 }
 0x2be   :  { %v459_v13 = vpop.f32.mrf.mxu1 }
 0x2bf   :  { %v460_v21 = vadd.f32 %v459_v13, %v364_v20 }
 0x2c0   :  { %v696_v14 = vpop.f32.mrf.mxu1 }
 0x2c1   :  { %v475_v15 = vadd.f32 %v696_v14, %v379_v10 }
 0x2c2   :  { %v469_v17 = vpop.f32.mrf.mxu1 }
 0x2c3   :  { %729 = vtanh.f32 %v475_v15  ;;  %v470_v19 = vadd.f32 %v469_v17, %v374_v12 }
 0x2c5   :  { %731 = vtanh.f32 %v470_v19 }
 0x2c6   :  { %733 = vtanh.f32 %v465_v18 }
 0x2c7   :  { %735 = vtanh.f32 %v460_v21 }
 0x2d0   :  { %v730_v22 = vpop.eup %729 }
 0x2d1   :  { %698 = vmatpush3.msra.mxu1 %v730_v22 }
 0x2d2   :  { %v732_v23 = vpop.eup %731  ;;  %699 = vmatprep.subr.mxu1 %v738_v9 }
 0x2d3   :  { %700 = vmatpush3.msra.mxu1 %v732_v23  ;;  %v734_v24 = vpop.eup %733 }
 0x2d4   :  { %701 = vmatprep.subr.mxu1 %v738_v9  ;;  %v736_v26 = vpop.eup %735 }
 0x2d5   :  { %702 = vmatpush3.msra.mxu1 %v734_v24 }
 0x2d6   :  { %703 = vmatprep.subr.mxu1 %v738_v9 }
 0x2d7   :  { %704 = vmatpush3.msra.mxu1 %v736_v26 }
 0x2d8   :  { %706 = vmatmul.mubr.msk.f32.vlgmr.msra.gmra.mxu1 %vm251_vm1, %v482_v25 }
 0x398   :  { %v552_v27 = vpop.f32.mrf.mxu1 }
 0x399   :  { %556 = vst [vmem:[%s964_s8] sm:$0x1] %v552_v27 }
 0x39a   :  { %v707_v28 = vpop.f32.mrf.mxu1 }

</bundles_post_ra>
